<compile_context>
chip_gen: v7x
topology: tpu7x:2x2x1
jax: 0.10.0
libtpu: 0.0.40
codegen_flags: <defaults>
</compile_context>

<pallas_src>
import functools

import jax
import jax.numpy as jnp
from jax.experimental import pallas as pl
from jax.experimental.pallas import tpu as pltpu


POOL_K = 5  # kernel_size == stride == 5, padding == 0


def _round_up(n: int, m: int) -> int:
    return ((n + m - 1) // m) * m


def _frame2segment_kernel(x_ref, o_ref, *, pool_k, d_model, inv_k):
    # x_ref: (seg_tile, pool_k * d_model)  -- frame k of segment s lives at lanes [k*D, (k+1)*D)
    # o_ref: (seg_tile, d_model)
    # Pool = sum of 5 contiguous lane slices (clean vlds, no strides), accumulate in f32.
    acc = x_ref[:, pl.ds(0, d_model)].astype(jnp.float32)
    for k in range(1, pool_k):
        acc = acc + x_ref[:, pl.ds(k * d_model, d_model)].astype(jnp.float32)
    o_ref[...] = (acc * jnp.float32(inv_k)).astype(o_ref.dtype)


def frame2segment(frame_features, *, pool_k=POOL_K, max_seg_tile=1024):
    """frame_features: (batch, frame_length, d_model) -> (batch, frame_length // 5, d_model)."""
    batch, frame_len, d_model = frame_features.shape
    if frame_len < pool_k:
        raise ValueError(f"frame_length={frame_len} must be >= pool kernel size {pool_k}")
    seg_len = frame_len // pool_k

    # Drop the ragged tail (only when present; costs one slice pass in that rare case), then
    # merge (frame -> (segment, k)) and (k, d) -> lanes.  For frame_len % 5 == 0 the reshape is
    # a pure bitcast under the default row-major layout, so HBM is still read exactly once.
    if frame_len != seg_len * pool_k:
        frame_features = jax.lax.slice_in_dim(frame_features, 0, seg_len * pool_k, axis=1)
    x_merged = frame_features.reshape(batch, seg_len, pool_k * d_model)

    itemsize = jnp.dtype(frame_features.dtype).itemsize
    # Per-segment VMEM bytes: double-buffered input block + double-buffered output block
    # + ~3 f32 row-temporaries (accumulator + in-flight widened slices).
    bytes_per_seg = (2 * pool_k * d_model * itemsize
                     + 2 * d_model * itemsize
                     + 3 * d_model * 4)

    # Chip-aware VMEM budgeting (v7x has 64 MiB per TC; v5e/v6e have 128 MiB).
    try:
        vmem_cap = int(pltpu.get_tpu_info().vmem_capacity_bytes)
    except Exception:  # unknown target -> assume the smallest (v7x-safe)
        vmem_cap = 64 * 1024 * 1024
    if vmem_cap <= 64 * 1024 * 1024:
        block_budget, vmem_limit = 22 * 1024 * 1024, 40 * 1024 * 1024
    else:
        block_budget, vmem_limit = 56 * 1024 * 1024, 96 * 1024 * 1024

    seg_tile = max(block_budget // bytes_per_seg, 8)
    seg_tile = min(seg_tile, max_seg_tile, _round_up(seg_len, 8))
    seg_tile = max((seg_tile // 8) * 8, 8)

    grid = (batch, pl.cdiv(seg_len, seg_tile))

    kernel = functools.partial(
        _frame2segment_kernel, pool_k=pool_k, d_model=d_model, inv_k=1.0 / pool_k,
    )

    out_elems = batch * seg_len * d_model
    cost = pl.CostEstimate(
        flops=pool_k * out_elems,                                   # 4 adds + 1 mul per output
        transcendentals=0,
        bytes_accessed=(batch * seg_len * pool_k * d_model + out_elems) * itemsize,
    )

    return pl.pallas_call(
        kernel,
        out_shape=jax.ShapeDtypeStruct((batch, seg_len, d_model), frame_features.dtype),
        grid_spec=pltpu.PrefetchScalarGridSpec(
            num_scalar_prefetch=0,
            grid=grid,
            in_specs=[
                pl.BlockSpec((None, seg_tile, pool_k * d_model), lambda b, s: (b, s, 0)),
            ],
            out_specs=pl.BlockSpec((None, seg_tile, d_model), lambda b, s: (b, s, 0)),
        ),
        compiler_params=pltpu.CompilerParams(
            dimension_semantics=("parallel", "parallel"),
            vmem_limit_bytes=vmem_limit,
        ),
        cost_estimate=cost,
    )(x_merged)


def frame2segment_reference(x, pool_k=POOL_K):
    b, l, d = x.shape
    s = l // pool_k
    xf = x[:, : s * pool_k, :].astype(jnp.float32).reshape(b, s, pool_k, d)
    return jnp.mean(xf, axis=2).astype(x.dtype)


if __name__ == "__main__":
    key = jax.random.PRNGKey(0)

    # Case 1: the module's natural small config (d_model=32), frame_len % 5 == 0, under jit
    # so the wrapper reshape fuses as a bitcast.
    batch, frame_len, d_model = 2, 80, 32
    x1 = jax.random.normal(key, (batch, frame_len, d_model), dtype=jnp.float32)
    out1 = jax.block_until_ready(jax.jit(frame2segment)(x1))
    ref1 = frame2segment_reference(x1)
    assert out1.shape == (batch, frame_len // POOL_K, d_model), out1.shape
    assert out1.dtype == x1.dtype
    assert jnp.allclose(out1, ref1, atol=1e-5, rtol=1e-5), "mismatch vs reference (case 1)"

    # Case 2: ragged frame_len (83 % 5 = 3 frames dropped), lane-dense d_model=128, and a
    # forced small segment tile so the last segment tile is partial (16 segments, tiles of 8).
    key2 = jax.random.PRNGKey(0)
    x2 = jax.random.normal(key2, (2, 83, 128), dtype=jnp.float32)
    out2 = jax.block_until_ready(frame2segment(x2, max_seg_tile=8))
    ref2 = frame2segment_reference(x2)
    assert out2.shape == (2, 83 // POOL_K, 128), out2.shape
    assert jnp.allclose(out2, ref2, atol=1e-5, rtol=1e-5), "mismatch vs reference (case 2)"

    print("KERNEL_OK")
</pallas_src>

<mosaic_0001>
module attributes {stable_mosaic.version = 11 : i64} {
  func.func @_frame2segment_kernel(%arg0: i32, %arg1: i32, %arg2: memref<1x16x160xf32, #tpu.memory_space<vmem>>, %arg3: memref<1x16x32xf32, #tpu.memory_space<vmem>>) attributes {dimension_semantics = [#tpu.dimension_semantics<parallel>, #tpu.dimension_semantics<parallel>], iteration_bounds = array<i64: 2, 1>, scalar_prefetch = 0 : i64, scratch_operands = 0 : i64, tpu.core_type = #tpu.core_type<tc>, window_params = [{transform_indices = @transform_0, window_bounds = array<i64: 1, 16, 160>}, {transform_indices = @transform_1, window_bounds = array<i64: 1, 16, 32>}]} {
    %c0 = arith.constant 0 : index
    %c0_0 = arith.constant 0 : index
    %c0_1 = arith.constant 0 : index
    %0 = vector.load %arg2[%c0, %c0_0, %c0_1] : memref<1x16x160xf32, #tpu.memory_space<vmem>>, vector<1x16x32xf32>
    %1 = vector.shape_cast %0 : vector<1x16x32xf32> to vector<16x32xf32>
    %c0_2 = arith.constant 0 : index
    %c0_3 = arith.constant 0 : index
    %c32 = arith.constant 32 : index
    %2 = vector.load %arg2[%c0_2, %c0_3, %c32] : memref<1x16x160xf32, #tpu.memory_space<vmem>>, vector<1x16x32xf32>
    %3 = vector.shape_cast %2 : vector<1x16x32xf32> to vector<16x32xf32>
    %4 = arith.addf %1, %3 : vector<16x32xf32>
    %c0_4 = arith.constant 0 : index
    %c0_5 = arith.constant 0 : index
    %c64 = arith.constant 64 : index
    %5 = vector.load %arg2[%c0_4, %c0_5, %c64] : memref<1x16x160xf32, #tpu.memory_space<vmem>>, vector<1x16x32xf32>
    %6 = vector.shape_cast %5 : vector<1x16x32xf32> to vector<16x32xf32>
    %7 = arith.addf %4, %6 : vector<16x32xf32>
    %c0_6 = arith.constant 0 : index
    %c0_7 = arith.constant 0 : index
    %c96 = arith.constant 96 : index
    %8 = vector.load %arg2[%c0_6, %c0_7, %c96] : memref<1x16x160xf32, #tpu.memory_space<vmem>>, vector<1x16x32xf32>
    %9 = vector.shape_cast %8 : vector<1x16x32xf32> to vector<16x32xf32>
    %10 = arith.addf %7, %9 : vector<16x32xf32>
    %c0_8 = arith.constant 0 : index
    %c0_9 = arith.constant 0 : index
    %c128 = arith.constant 128 : index
    %11 = vector.load %arg2[%c0_8, %c0_9, %c128] : memref<1x16x160xf32, #tpu.memory_space<vmem>>, vector<1x16x32xf32>
    %12 = vector.shape_cast %11 : vector<1x16x32xf32> to vector<16x32xf32>
    %13 = arith.addf %10, %12 : vector<16x32xf32>
    %cst = arith.constant 2.000000e-01 : f32
    %14 = vector.broadcast %cst : f32 to vector<16x32xf32>
    %15 = arith.mulf %13, %14 : vector<16x32xf32>
    %c0_10 = arith.constant 0 : index
    %c0_11 = arith.constant 0 : index
    %c0_12 = arith.constant 0 : index
    %16 = vector.load %arg3[%c0_10, %c0_11, %c0_12] : memref<1x16x32xf32, #tpu.memory_space<vmem>>, vector<1x16x32xf32>
    %17 = vector.shape_cast %16 : vector<1x16x32xf32> to vector<16x32xf32>
    %18 = vector.shape_cast %15 : vector<16x32xf32> to vector<1x16x32xf32>
    tpu.vector_store %arg3[%c0_10, %c0_11, %c0_12], %18 {strides = array<i32>} : memref<1x16x32xf32, #tpu.memory_space<vmem>>, vector<1x16x32xf32>,
    return
  }
  func.func @transform_0(%arg0: i32, %arg1: i32) -> (i32, i32, i32) {
    %c0_i32 = arith.constant 0 : i32
    %c0_i32_0 = arith.constant 0 : i32
    return %arg0, %arg1, %c0_i32 : i32, i32, i32
  }
  func.func @transform_1(%arg0: i32, %arg1: i32) -> (i32, i32, i32) {
    %c0_i32 = arith.constant 0 : i32
    %c0_i32_0 = arith.constant 0 : i32
    return %arg0, %arg1, %c0_i32 : i32, i32, i32
  }
}

</mosaic_0001>

<bundles_post_ra>
// kernel: frame2segment.1
= control target key start
LH: loop header
LB: loop body
LE: loop exit
PB: predicated region body
PF: predicated region fallthrough
CT: control target
= control target key end

     0   :  { %6 = vsyncpa [#allocation3], 0  ;;  %s570_s0 = inlined_call_operand.vmem [shape: f32[2,16,160], index: 0, kind: input, shape index: {}]   ;;  %s571_s1 = inlined_call_operand.hbm [shape: f32[2,16,32], index: 1, kind: output, shape index: {}]  }
   0x1   :  { %8 = vsyncpa [#allocation3 + $0x1], 0  ;;  %s455_s6 = smov 0   ;;  %s457_s7 = smov 0  }
   0x2   :  { %s459_s8 = smov 0   ;;  %s461_s9 = smov 0  }
   0x3   :  { %s463_s10 = smov 0   ;;  %s465_s11 = smov 0  }
   0x4 LB: > { %s284_s12 = sadd.s32 4294967295, %s437_s11   ;;  %s285_s13 = sadd.s32 4294967294, %s437_s11   ;;  %s437_s11 = sphi %s465_s11, %s14_s11   ;;  %s433_s10 = sphi %s463_s10, %s578_s10   ;;  %s429_s9 = sphi %s461_s9, %s577_s9   ;;  %s425_s8 = sphi %s459_s8, %s576_s8   ;;  %s421_s7 = sphi %s457_s7, %s575_s7   ;;  %s417_s6 = sphi %s455_s6, %s574_s6  }
   0x5   : > { %s26_s14 = sadd.s32 1, %s433_s10  ;;  %s63_s15 = sadd.s32 1, %s425_s8 }
   0x6   : > { %p28_p0 = scmp.ge.s32.totalorder %s26_s14, 2  ;;  %p73_p1 = scmp.ne.s32.totalorder %s425_s8, %s421_s7 }
   0x7   : > { %p74_p2 = scmp.eq.s32.totalorder %s284_s12, 1  ;;  %p79_p3 = scmp.ne.s32.totalorder %s421_s7, %s417_s6 }
   0x8   : > { %s580_s14 = smov (%p28_p0, %s26_s14), 0  ;;  %p80_p5 = scmp.eq.s32.totalorder %s285_s13, 1 }
   0x9   : > { %p495_p4 = por %p74_p2, %p73_p1  ;;  %s58_s17 = ssub.s32 %s433_s10, %s580_s14 }
   0xa   : > { %p288_p6 = scmp.ge.s32.totalorder %s437_s11, 1  ;;  %p61_p7 = scmp.eq.s32.totalorder %s58_s17, 0 }
   0xb   : > { %p502_p8 = por %p80_p5, %p79_p3  ;;  %p112_p9 = scmp.lt.s32.totalorder %s437_s11, 3 }
   0xc   : > { %s508_s19 = scalar_select %p61_p7, %s425_s8, %s63_s15  }
   0xd   : > { %p113_p10 = pnand %p288_p6, %p112_p9 }
   0xe   : > { %p138_p11 = scmp.lt.s32.totalorder (!%p113_p10), %s429_s9, 1  ;;  %s439_s25 = smov (!%p113_p10), 64   ;;  %vm183_vm0 = vcmask (!%p113_p10), 261120  }
   0xf   : > { %116 = sbr.rel (%p113_p10) target bundleno = 171 (0xab), region = 24  ;;  %s440_s26 = smov (!%p113_p10), 96  }
  0x10   : > { %s441_s27 = smov (!%p113_p10), 32   ;;  %s134_s28 = sand.u32 (!%p113_p10), 1, %s421_s7  }
  0x11   : > { %s289_s29 = sshll.u32 (!%p113_p10), %s134_s28, 4  ;;  %s298_s30 = sshll.u32 (!%p113_p10), %s429_s9, 8 }
  0x12   : > { %s136_s2 = scalar_lea.vmem (!%p113_p10), [#allocation2], %s289_s29  ;;  %s520_s12 = scalar_lea.hbm (!%p113_p10), %s571_s1, %s298_s30 }
  0x13   : > { %s202_s3 = sshll.u32 (!%p113_p10), %s136_s2, 4  ;;  %s442_s15 = smov (!%p113_p10), [#allocation2]   ;;  %s522_s3 = int_to_ptr.vmem [resolvable:$true] %s202_s3 }
  0x14   : > { %s359_s13 = scalar_lea.vmem (!%p113_p10), %s522_s3, 256  ;;  %s363_s17 = sshll.u32 (!%p113_p10), %s442_s15, 4  ;;  %s364_s17 = int_to_ptr.vmem [resolvable:$false] %s363_s17 }
  0x15   : > { %p360_p12 = scmp.ne.s32.totalorder (!%p113_p10), %s522_s3, %s359_s13  ;;  %p366_p1 = scmp.lt.s32.totalorder (!%p113_p10), %s522_s3, %s364_s17 }
  0x16   : > { %s139_s20 = scalar_select %p138_p11, %s429_s9, 1 }
  0x17   : > { %s524_s9 = scalar_lea.sflag [#allocation3], %s134_s28  ;;  %p361_p13 = pnand %p360_p12, %p495_p4 }
  0x18   : > { %s297_s21 = sshll.u32 %s139_s20, 5  ;;  %s365_s20 = scalar_lea.vmem %s364_s17, 512 }
  0x19   : > { %s146_s24 = scalar_lea.vmem %s570_s0, %s297_s21  ;;  %p362_p0 = pneg %p361_p13 }
  0x1a   : > { %v149_v0 = vld [vmem:[%s146_s24] sm:$0xff]  ;;  %v150_v1 = vld [vmem:[%s146_s24 + $0x10] sm:$0xff]  ;;  %v178_v10 = vld [vmem:[%s146_s24 + $0x18] sm:$0xff]  ;;  %p367_p2 = scmp.lt.s32.totalorder %s365_s20, %s359_s13 }
  0x1b   : > { %161 = vrot.lane.b32.xlu1 %v149_v0, %s439_s25  ;;  %153 = vrot.lane.b32.xlu0 %v149_v0, %s440_s26  ;;  %v177_v12 = vld [vmem:[%s146_s24 + $0x8] sm:$0xff] }
  0x1c   : > { %p368_p3 = por %p367_p2, %p366_p1 }
  0x1e   : > { %p369_p5 = pnand %p368_p3, %p362_p0 }
  0x1f   : > { %163 = vrot.lane.b32.xlu1 %v150_v1, %s439_s25  ;;  %155 = vrot.lane.b32.xlu0 %v150_v1, %s440_s26 }
  0x23   : > { %171 = vrot.lane.b32.xlu1 %v150_v1, %s441_s27  ;;  %169 = vrot.lane.b32.xlu0 %v149_v0, %s441_s27 }
  0x8d   : > { %v162_v2 = vpop.permute.xlu1 %161  ;;  %v154_v3 = vpop.permute.xlu0 %153 }
  0x8e   : > { %v159_v4 = vadd.f32 %v154_v3, %v149_v0 }
  0x90   : > { %v167_v9 = vadd.f32 %v162_v2, %v159_v4 }
  0x91   : > { %v164_v5 = vpop.permute.xlu1 %163  ;;  %v156_v6 = vpop.permute.xlu0 %155 }
  0x92   : > { %v160_v7 = vadd.f32 %v156_v6, %v150_v1 }
  0x94   : > { %v168_v8 = vadd.f32 %v164_v5, %v160_v7 }
  0x95   : > { %v172_v11 = vpop.permute.xlu1 %171  ;;  %v170_v13 = vpop.permute.xlu0 %169 }
  0x96   : > { %v176_v14 = vadd.f32 %v172_v11, %v168_v8  ;;  %v175_v15 = vadd.f32 %v170_v13, %v167_v9 }
  0x98   : > { %v180_v16 = vadd.f32 %v178_v10, %v176_v14  ;;  %v179_v17 = vadd.f32 %v177_v12, %v175_v15 }
  0x9a   : > { %v182_v18 = vmul.f32 0.2, %v180_v16  ;;  %v181_v19 = vmul.f32 0.2, %v179_v17 }
  0x9c   : > { %185 = vst.msk [vmem:[%s136_s2 + $0x8] sm:$0xff] %vm183_vm0, %v182_v18  ;;  %184 = vst.msk [vmem:[%s136_s2] sm:$0xff] %vm183_vm0, %v181_v19 }
  0x9d   : > { %372 = shalt.err (!%p369_p5)
}
  0x9e   : > { %s373_s21 = scalar_lea.hbm %s520_s12, 256  ;;  %s377_s24 = scalar_lea.hbm %s571_s1, 512 }
  0x9f   : > { %p374_p6 = scmp.ne.s32.totalorder %s520_s12, %s373_s21  ;;  %p378_p10 = scmp.lt.u32.totalorder %s520_s12, %s571_s1 }
  0xa0   : > { %p379_p11 = scmp.lt.u32.totalorder %s377_s24, %s373_s21  ;;  %p381_p13 = scmp.lt.u32.totalorder %s373_s21, %s520_s12 }
  0xa1   : > { %p375_p7 = pnand %p374_p6, %p495_p4 }
  0xa2   : > { %p380_p12 = por %p379_p11, %p378_p10 }
  0xa3   : > { %p376_p9 = pneg %p375_p7 }
  0xa4   : > { %p382_p0 = por %p381_p13, %p380_p12 }
  0xa6   : > { %p383_p1 = pnand %p382_p0, %p376_p9 }
  0xa8   : > { %386 = shalt.err (!%p383_p1)
}
  0xa9   : > { %s443_s27 = smov 128   ;;  %s444_s28 = smov 8  }
  0xaa   : > { %299 = dma.vmem_to_hbm [thread:$0]  (%p495_p4), %s522_s3, 256, %s520_s12, %s524_s9, %s443_s27, %s443_s27, %s444_s28  }
  0xab PF: > { %p305_p2 = scmp.ge.s32.totalorder %s437_s11, 2  ;;  %s217_s29 = sand.u32 1, %s417_s6  }
  0xac   : > { %s218_s30 = scalar_lea.sflag [#allocation3], %s217_s29 }
  0xad   : > { %p302_p3 = pnand %p305_p2, %p502_p8 }
  0xaf   : > { %412 = dma.done.wait (!%p302_p3), %s218_s30, 256  }
  0xb0   : > { %414 = vsyncadd (!%p302_p3), %s218_s30, 4294967040  ;;  %s14_s11 = sadd.s32 1, %s437_s11   ;;  %s574_s6 = smov %s421_s7 }
  0xb1   : > { %p11_p5 = scmp.ge.s32.totalorder %s14_s11, 4   ;;  %s575_s7 = smov %s425_s8 }
  0xb2   : > { %s576_s8 = smov %s508_s19  ;;  %s577_s9 = smov %s433_s10 }
  0xb3   : > { %s578_s10 = smov %s580_s14  ;;  %13 = sbr.rel (!%p11_p5) target bundleno = 4 (0x4), region = 59 }
  0xba   :  { %223 = vsyncpa [#allocation3], 1 }
  0xbb   :  { %225 = vsyncpa [#allocation3 + $0x1], 1 }

</bundles_post_ra>
